<compile_context>
chip_gen: v6e
topology: v6e:2x2x1
jax: 0.10.0
libtpu: 0.0.40
codegen_flags: <defaults>
</compile_context>

<pallas_src>
import jax
import jax.numpy as jnp
from jax.experimental import pallas as pl
from jax.experimental.pallas import tpu as pltpu


def se_kernel(x_ref, w1t_ref, b1_ref, w2t_ref, b2_ref, o_ref):
    # x_ref: (TB, C, HW)   w1t_ref: (C, Cr)   b1_ref: (1, Cr)
    # w2t_ref: (Cr, C)     b2_ref: (1, C)     o_ref: (TB, C, HW)
    inv_hw = 1.0 / x_ref.shape[-1]

    # Squeeze: global average pool over the spatial (lane) axis.
    pooled = jnp.sum(x_ref[...], axis=-1) * inv_hw                    # (TB, C)

    # Excitation: fc1 (1x1 conv == matmul) + ReLU, then fc2 + sigmoid.
    h = jnp.dot(pooled, w1t_ref[...],
                preferred_element_type=jnp.float32) + b1_ref[...]     # (TB, Cr)
    h = jnp.maximum(h, 0.0)
    s = jnp.dot(h, w2t_ref[...],
                preferred_element_type=jnp.float32) + b2_ref[...]     # (TB, C)
    s = 1.0 / (1.0 + jnp.exp(-s))                                     # sigmoid

    # Scale: re-read x_ref so the big tile is not held live across the FCs.
    o_ref[...] = (x_ref[...] * s[:, :, None]).astype(o_ref.dtype)


def _pick_batch_tile(B, C, HW, itemsize=4, tile_budget_bytes=32 * 1024 * 1024):
    """Largest divisor of B whose double-buffered in+out tiles fit the budget,
    clamped so the grid keeps >= 2 steps (v7x megacore) when B >= 2."""
    bytes_per_batch = 2 * 2 * C * HW * itemsize   # (in + out) x double buffer
    cap = max(1, tile_budget_bytes // bytes_per_batch)
    if B >= 2:
        cap = min(cap, max(1, B // 2))
    tb = 1
    for d in range(1, min(cap, B) + 1):
        if B % d == 0:
            tb = d
    return tb


def se_module(x, w1, b1, w2, b2):
    """x: (B, C, H, W) float32; w1: (Cr, C), b1: (Cr,), w2: (C, Cr), b2: (C,)."""
    B, C, H, W = x.shape
    HW = H * W
    Cr = w1.shape[0]

    x_flat = x.reshape(B, C, HW)
    w1_t = w1.T                      # (C, Cr)  pre-transposed on host
    w2_t = w2.T                      # (Cr, C)
    b1_2d = b1.reshape(1, Cr)
    b2_2d = b2.reshape(1, C)

    TB = _pick_batch_tile(B, C, HW, itemsize=x.dtype.itemsize)
    grid = (B // TB,)

    # TODO(synk): if a single (1, C, HW) tile ever exceeds VMEM, split HW with a
    # two-pass (pool then scale) pipeline; not needed at these model sizes.
    cost = pl.CostEstimate(
        flops=2 * B * C * HW + 4 * B * C * Cr,       # reduce+scale + two FCs
        transcendentals=B * C,                        # sigmoid exp
        bytes_accessed=2 * B * C * HW * x.dtype.itemsize,
    )

    out_flat = pl.pallas_call(
        se_kernel,
        out_shape=jax.ShapeDtypeStruct((B, C, HW), x.dtype),
        grid_spec=pltpu.PrefetchScalarGridSpec(
            num_scalar_prefetch=0,
            grid=grid,
            in_specs=[
                pl.BlockSpec((TB, C, HW), lambda b: (b, 0, 0)),   # x tile
                pl.BlockSpec((C, Cr),     lambda b: (0, 0)),      # fc1 weight^T
                pl.BlockSpec((1, Cr),     lambda b: (0, 0)),      # fc1 bias
                pl.BlockSpec((Cr, C),     lambda b: (0, 0)),      # fc2 weight^T
                pl.BlockSpec((1, C),      lambda b: (0, 0)),      # fc2 bias
            ],
            out_specs=pl.BlockSpec((TB, C, HW), lambda b: (b, 0, 0)),
        ),
        compiler_params=pltpu.CompilerParams(
            dimension_semantics=("parallel",),
            # Above v5e's 16 MiB scoped default, below v7x's 64 MiB physical,
            # matches the ~32 MiB tile budget + small weights/biases.
            vmem_limit_bytes=48 * 1024 * 1024,
        ),
        cost_estimate=cost,
    )(x_flat, w1_t, b1_2d, w2_t, b2_2d)

    return out_flat.reshape(B, C, H, W)


def se_reference(x, w1, b1, w2, b2):
    pooled = jnp.mean(x, axis=(2, 3))                         # (B, C)
    h = jnp.maximum(pooled @ w1.T + b1, 0.0)                  # (B, Cr)
    s = jax.nn.sigmoid(h @ w2.T + b2)                         # (B, C)
    return x * s[:, :, None, None]


if __name__ == "__main__":
    # SEModule(in_chans=32, reduction=16) -> hidden = 2
    B, C, H, W = 2, 32, 16, 16
    reduction = 16
    Cr = C // reduction

    key = jax.random.PRNGKey(0)
    kx, kw1, kb1, kw2, kb2 = jax.random.split(key, 5)

    x = jax.random.normal(kx, (B, C, H, W), dtype=jnp.float32)
    # fc1: Conv2d(C, Cr, 1) -> weight (Cr, C), bias (Cr,)
    w1 = jax.random.normal(kw1, (Cr, C), dtype=jnp.float32) * 0.1
    b1 = jax.random.normal(kb1, (Cr,), dtype=jnp.float32) * 0.1
    # fc2: Conv2d(Cr, C, 1) -> weight (C, Cr), bias (C,)
    w2 = jax.random.normal(kw2, (C, Cr), dtype=jnp.float32) * 0.1
    b2 = jax.random.normal(kb2, (C,), dtype=jnp.float32) * 0.1

    out = jax.block_until_ready(se_module(x, w1, b1, w2, b2))
    ref = jax.block_until_ready(se_reference(x, w1, b1, w2, b2))

    assert out.shape == (B, C, H, W)
    assert jnp.allclose(out, ref, atol=1e-5, rtol=1e-5)
    print("KERNEL_OK")
</pallas_src>

<mosaic_0001>
module attributes {stable_mosaic.version = 11 : i64} {
  func.func @se_kernel(%arg0: i32, %arg1: memref<1x32x256xf32, #tpu.memory_space<vmem>>, %arg2: memref<32x2xf32, #tpu.memory_space<vmem>>, %arg3: memref<1x2xf32, #tpu.memory_space<vmem>>, %arg4: memref<2x32xf32, #tpu.memory_space<vmem>>, %arg5: memref<1x32xf32, #tpu.memory_space<vmem>>, %arg6: memref<1x32x256xf32, #tpu.memory_space<vmem>>) attributes {dimension_semantics = [#tpu.dimension_semantics<parallel>], iteration_bounds = array<i64: 2>, scalar_prefetch = 0 : i64, scratch_operands = 0 : i64, tpu.core_type = #tpu.core_type<tc>, window_params = [{transform_indices = @transform_0, window_bounds = array<i64: 1, 32, 256>}, {pipeline_mode = #tpu.pipeline_mode<synchronous>, transform_indices = @transform_1, window_bounds = array<i64: 32, 2>}, {pipeline_mode = #tpu.pipeline_mode<synchronous>, transform_indices = @transform_2, window_bounds = array<i64: 1, 2>}, {pipeline_mode = #tpu.pipeline_mode<synchronous>, transform_indices = @transform_3, window_bounds = array<i64: 2, 32>}, {pipeline_mode = #tpu.pipeline_mode<synchronous>, transform_indices = @transform_4, window_bounds = array<i64: 1, 32>}, {transform_indices = @transform_5, window_bounds = array<i64: 1, 32, 256>}]} {
    %c0 = arith.constant 0 : index
    %c0_0 = arith.constant 0 : index
    %c0_1 = arith.constant 0 : index
    %0 = vector.load %arg1[%c0, %c0_0, %c0_1] : memref<1x32x256xf32, #tpu.memory_space<vmem>>, vector<1x32x256xf32>
    %cst = arith.constant dense<0.000000e+00> : vector<1x32xf32>
    %1 = vector.multi_reduction <add>, %0, %cst [2] : vector<1x32x256xf32> to vector<1x32xf32>
    %cst_2 = arith.constant 3.906250e-03 : f32
    %2 = vector.broadcast %cst_2 : f32 to vector<1x32xf32>
    %3 = arith.mulf %1, %2 : vector<1x32xf32>
    %c0_3 = arith.constant 0 : index
    %c0_4 = arith.constant 0 : index
    %4 = vector.load %arg2[%c0_3, %c0_4] : memref<32x2xf32, #tpu.memory_space<vmem>>, vector<32x2xf32>
    %cst_5 = arith.constant dense<0.000000e+00> : vector<1x2xf32>
    %5 = tpu.matmul %3, %4, %cst_5 {dimension_numbers = #tpu.dot_dimension_numbers<[1], [0], [0], [1], [0, 0, 1, 1], [], []>} : vector<1x32xf32>, vector<32x2xf32>, vector<1x2xf32> -> vector<1x2xf32>
    %c0_6 = arith.constant 0 : index
    %c0_7 = arith.constant 0 : index
    %6 = vector.load %arg3[%c0_6, %c0_7] : memref<1x2xf32, #tpu.memory_space<vmem>>, vector<1x2xf32>
    %7 = arith.addf %5, %6 : vector<1x2xf32>
    %cst_8 = arith.constant 0.000000e+00 : f32
    %8 = vector.broadcast %cst_8 : f32 to vector<1x2xf32>
    %9 = arith.maximumf %7, %8 : vector<1x2xf32>
    %c0_9 = arith.constant 0 : index
    %c0_10 = arith.constant 0 : index
    %10 = vector.load %arg4[%c0_9, %c0_10] : memref<2x32xf32, #tpu.memory_space<vmem>>, vector<2x32xf32>
    %cst_11 = arith.constant dense<0.000000e+00> : vector<1x32xf32>
    %11 = tpu.matmul %9, %10, %cst_11 {dimension_numbers = #tpu.dot_dimension_numbers<[1], [0], [0], [1], [0, 0, 1, 1], [], []>} : vector<1x2xf32>, vector<2x32xf32>, vector<1x32xf32> -> vector<1x32xf32>
    %c0_12 = arith.constant 0 : index
    %c0_13 = arith.constant 0 : index
    %12 = vector.load %arg5[%c0_12, %c0_13] : memref<1x32xf32, #tpu.memory_space<vmem>>, vector<1x32xf32>
    %13 = arith.addf %11, %12 : vector<1x32xf32>
    %cst_14 = arith.constant 0.000000e+00 : f32
    %14 = vector.broadcast %cst_14 : f32 to vector<1x32xf32>
    %15 = arith.subf %14, %13 : vector<1x32xf32>
    %16 = math.exp %15 : vector<1x32xf32>
    %cst_15 = arith.constant 1.000000e+00 : f32
    %17 = vector.broadcast %cst_15 : f32 to vector<1x32xf32>
    %18 = arith.addf %17, %16 : vector<1x32xf32>
    %cst_16 = arith.constant 1.000000e+00 : f32
    %19 = vector.broadcast %cst_16 : f32 to vector<1x32xf32>
    %20 = arith.divf %19, %18 : vector<1x32xf32>
    %c0_17 = arith.constant 0 : index
    %c0_18 = arith.constant 0 : index
    %c0_19 = arith.constant 0 : index
    %21 = vector.load %arg1[%c0_17, %c0_18, %c0_19] : memref<1x32x256xf32, #tpu.memory_space<vmem>>, vector<1x32x256xf32>
    %22 = vector.shape_cast %20 : vector<1x32xf32> to vector<1x32x1xf32>
    %23 = vector.broadcast %22 : vector<1x32x1xf32> to vector<1x32x256xf32>
    %24 = arith.mulf %21, %23 : vector<1x32x256xf32>
    %c0_20 = arith.constant 0 : index
    %c0_21 = arith.constant 0 : index
    %c0_22 = arith.constant 0 : index
    %25 = vector.load %arg6[%c0_20, %c0_21, %c0_22] : memref<1x32x256xf32, #tpu.memory_space<vmem>>, vector<1x32x256xf32>
    tpu.vector_store %arg6[%c0_20, %c0_21, %c0_22], %24 {strides = array<i32>} : memref<1x32x256xf32, #tpu.memory_space<vmem>>, vector<1x32x256xf32>,
    return
  }
  func.func @transform_0(%arg0: i32) -> (i32, i32, i32) {
    %c0_i32 = arith.constant 0 : i32
    %c0_i32_0 = arith.constant 0 : i32
    %c0_i32_1 = arith.constant 0 : i32
    return %arg0, %c0_i32, %c0_i32_0 : i32, i32, i32
  }
  func.func @transform_1(%arg0: i32) -> (i32, i32) {
    %c0_i32 = arith.constant 0 : i32
    %c0_i32_0 = arith.constant 0 : i32
    %c0_i32_1 = arith.constant 0 : i32
    return %c0_i32, %c0_i32_0 : i32, i32
  }
  func.func @transform_2(%arg0: i32) -> (i32, i32) {
    %c0_i32 = arith.constant 0 : i32
    %c0_i32_0 = arith.constant 0 : i32
    %c0_i32_1 = arith.constant 0 : i32
    return %c0_i32, %c0_i32_0 : i32, i32
  }
  func.func @transform_3(%arg0: i32) -> (i32, i32) {
    %c0_i32 = arith.constant 0 : i32
    %c0_i32_0 = arith.constant 0 : i32
    %c0_i32_1 = arith.constant 0 : i32
    return %c0_i32, %c0_i32_0 : i32, i32
  }
  func.func @transform_4(%arg0: i32) -> (i32, i32) {
    %c0_i32 = arith.constant 0 : i32
    %c0_i32_0 = arith.constant 0 : i32
    %c0_i32_1 = arith.constant 0 : i32
    return %c0_i32, %c0_i32_0 : i32, i32
  }
  func.func @transform_5(%arg0: i32) -> (i32, i32, i32) {
    %c0_i32 = arith.constant 0 : i32
    %c0_i32_0 = arith.constant 0 : i32
    %c0_i32_1 = arith.constant 0 : i32
    return %arg0, %c0_i32, %c0_i32_0 : i32, i32, i32
  }
}

</mosaic_0001>

<bundles_post_ra>
// kernel: tpu_custom_call.1
= control target key start
LH: loop header
LB: loop body
LE: loop exit
PB: predicated region body
PF: predicated region fallthrough
CT: control target
= control target key end

     0   :  { %10 = vsyncpa [#allocation3], 0  ;;  %s1026_s0 = inlined_call_operand.hbm [shape: f32[2,32,256], index: 0, kind: input, shape index: {}]   ;;  %s1027_s1 = inlined_call_operand.vmem [shape: f32[32,2], index: 1, kind: input, shape index: {}]   ;;  %s1028_s2 = inlined_call_operand.vmem [shape: f32[1,2], index: 2, kind: input, shape index: {}]   ;;  %s1029_s3 = inlined_call_operand.vmem [shape: f32[2,32], index: 3, kind: input, shape index: {}]   ;;  %s1030_s4 = inlined_call_operand.vmem [shape: f32[1,32], index: 4, kind: input, shape index: {}]   ;;  %s1031_s5 = inlined_call_operand.hbm [shape: f32[2,32,256], index: 5, kind: output, shape index: {}]  }
   0x1   :  { %12 = vsyncpa [#allocation3 + $0x1], 0 }
   0x2   :  { %13 = vsyncpa [#allocation4], 0 }
   0x3   :  { %15 = vsyncpa [#allocation4 + $0x1], 0  ;;  %s815_s18 = smov 0   ;;  %s817_s19 = smov 0  }
   0x4   :  { %s819_s20 = smov 0   ;;  %s821_s21 = smov 0  }
   0x5 LB: > { %s836_s22 = sadd.s32 4294967295, %s775_s21   ;;  %s585_s23 = sadd.s32 4294967294, %s775_s21   ;;  %s775_s21 = sphi %s821_s21, %s1046_s21   ;;  %s771_s20 = sphi %s819_s20, %s1045_s20   ;;  %s767_s19 = sphi %s817_s19, %s1044_s19   ;;  %s763_s18 = sphi %s815_s18, %s1043_s18  }
   0x6   : > { %s840_s24 = sadd.s32 1, %s775_s21   ;;  %s28_s25 = sadd.s32 1, %s771_s20 }
   0x7   : > { %s25_s26 = ssub.s32 %s775_s21, %s840_s24  ;;  %p35_p0 = scmp.ne.s32.totalorder %s771_s20, %s767_s19 }
   0x8   : > { %p26_p1 = scmp.eq.s32.totalorder %s25_s26, 0  ;;  %p36_p2 = scmp.eq.s32.totalorder %s775_s21, 0 }
   0x9   : > { %p41_p3 = scmp.ne.s32.totalorder %s767_s19, %s763_s18  ;;  %p42_p4 = scmp.eq.s32.totalorder %s836_s22, 0 }
   0xa   : > { %s852_s27 = scalar_select %p26_p1, %s771_s20, %s28_s25  }
   0xb   : > { %p854_p5 = por %p36_p2, %p35_p0  ;;  %p858_p6 = por %p42_p4, %p41_p3 }
   0xc   : > { %p149_p7 = scmp.eq.s32.totalorder %s836_s22, 1  ;;  %p155_p8 = scmp.eq.s32.totalorder %s585_s23, 1 }
   0xd   : > { %s1035_s29 = scalar_select %p858_p6, 1, 0 }
   0xe   : > { %p639_p10 = scmp.lt.s32.totalorder %s775_s21, 2  ;;  %p865_p11 = por %p149_p7, %p35_p0 }
   0xf   : > { %p869_p12 = por %p155_p8, %p41_p3  ;;  %s187_s7 = sand.u32 1, %s771_s20  }
  0x10   : > { %s1036_s30 = scalar_select %p865_p11, 1, 0 }
  0x11   : > { %s1037_s6 = scalar_select %p869_p12, 1, 0 }
  0x12   : > { %s602_s8 = sshll.u32 %s775_s21, 10  ;;  %s588_s9 = sshll.u32 %s187_s7, 6 }
  0x13   : > { %s878_s12 = scalar_lea.hbm %s1026_s0, %s602_s8  ;;  %s191_s13 = scalar_lea.vmem [#allocation2], %s588_s9 }
  0x14   : > { %s198_s14 = sshll.u32 %s191_s13, 4  ;;  %p882_p13 = pnand %p639_p10, %p854_p5  ;;  %s886_s14 = int_to_ptr.vmem [resolvable:$true] %s198_s14 }
  0x15   : > { %s888_s16 = scalar_lea.sflag [#allocation3], %s187_s7  ;;  %s683_s17 = scalar_lea.hbm %s878_s12, 1024 }
  0x16   : > { %p684_p0 = scmp.ne.s32.totalorder %s878_s12, %s683_s17  ;;  %p685_p1 = pneg %p882_p13 }
  0x17   : > { %s688_s26 = scalar_lea.hbm %s1026_s0, 2048  ;;  %p689_p4 = scmp.lt.s32.totalorder %s878_s12, %s1026_s0 }
  0x18   : > { %p686_p2 = pnand %p685_p1, %p684_p0  ;;  %p690_p5 = scmp.lt.s32.totalorder %s688_s26, %s683_s17 }
  0x1a   : > { %p687_p3 = pneg %p686_p2  ;;  %p691_p7 = por %p690_p5, %p689_p4 }
  0x1c   : > { %p692_p8 = pnand %p691_p7, %p687_p3 }
  0x1e   : > { %695 = shalt.err (!%p692_p8)
}
  0x1f   : > { %s696_s7 = scalar_lea.vmem %s886_s14, 1024  ;;  %s777_s9 = smov [#allocation2]  }
  0x20   : > { %p697_p10 = scmp.ne.s32.totalorder %s886_s14, %s696_s7  ;;  %s701_s10 = sshll.u32 %s777_s9, 4  ;;  %s702_s10 = int_to_ptr.vmem [resolvable:$false] %s701_s10 }
  0x21   : > { %s703_s11 = scalar_lea.vmem %s702_s10, 2048  ;;  %p704_p2 = scmp.lt.s32.totalorder %s886_s14, %s702_s10 }
  0x22   : > { %p699_p9 = pnand %p697_p10, %p685_p1  ;;  %p705_p12 = scmp.lt.s32.totalorder %s703_s11, %s696_s7 }
  0x24   : > { %p700_p0 = pneg %p699_p9  ;;  %p706_p11 = por %p705_p12, %p704_p2 }
  0x26   : > { %p707_p6 = pnand %p706_p11, %p700_p0 }
  0x28   : > { %710 = shalt.err (!%p707_p6)
}
  0x29   : > { %s778_s13 = smov 256   ;;  %s779_s17 = smov 16  }
  0x2a   : > { %634 = dma.hbm_to_vmem [thread:$0]  (!%p882_p13), %s878_s12, 1024, %s886_s14, %s888_s16, %s778_s13, %s778_s13, %s779_s17  }
  0x2b   : > { %p591_p9 = scmp.ge.s32.totalorder %s775_s21, 1  ;;  %p206_p1 = scmp.lt.s32.totalorder %s775_s21, 3 }
  0x2d   : > { %p207_p3 = pnand %p591_p9, %p206_p1 }
  0x2e   : > { %s912_s23 = sand.u32 (!%p207_p3), 1, %s767_s19   ;;  %p1039_p6 = scmp.ne.s32.totalorder (!%p207_p3), %s1035_s29, 0 }
  0x2f   : > { %210 = sbr.rel (%p207_p3) target bundleno = 772 (0x304), region = 40  ;;  %s592_s25 = sshll.u32 (!%p207_p3), %s912_s23, 6 }
  0x30   : > { %s213_s26 = scalar_lea.sflag (!%p207_p3), [#allocation3], %s912_s23  ;;  %s216_s28 = scalar_lea.vmem (!%p207_p3), [#allocation2], %s592_s25 }
  0x34   : > { %754 = dma.done.wait (%p1039_p6), %s213_s26, 1024  }
  0x35   : > { %756 = vsyncadd (%p1039_p6), %s213_s26, 4294966272  ;;  %v922_v0 = vld [vmem:[%s216_s28] sm:$0xff]  ;;  %v924_v1 = vld [vmem:[%s216_s28 + $0x8] sm:$0xff]  ;;  %v780_v12 = vmov 0.0   ;;  %vm781_vm0 = vmmov 0   ;;  %v276_v17 = vlaneseq  ;;  %vm287_vm1 = vcmask 130112  }
  0x36   : > { %v926_v2 = vld [vmem:[%s216_s28 + $0x20] sm:$0xff]  ;;  %v251_v3 = vadd.f32 %v924_v1, %v922_v0  ;;  %v930_v4 = vld [vmem:[%s216_s28 + $0x28] sm:$0xff]  ;;  %v932_v5 = vld [vmem:[%s216_s28 + $0x10] sm:$0xff]  ;;  %611 = vmatprep.subr.mxu0 %v780_v12  ;;  %622 = vmatprep.subr.mxu1 %v780_v12  ;;  %vm294_vm2 = vcmask 195712   ;;  %vm301_vm3 = vcmask 261312   ;;  %vm303_vm4 = vcmask 261120  }
  0x37   : > { %v934_v6 = vld [vmem:[%s216_s28 + $0x18] sm:$0xff]  ;;  %v257_v7 = vadd.f32 %v930_v4, %v926_v2  ;;  %v938_v8 = vld [vmem:[%s216_s28 + $0x30] sm:$0xff]  ;;  %v268_v15 = vld [vmem:[%s1027_s1 + $0x8] sm:$0xff]  ;;  %619 = vmatprep.mubr.msk.f32.mxu0 %vm781_vm0, %v780_v12  ;;  %624 = vmatprep.mubr.msk.f32.mxu1 %vm781_vm0, %v780_v12  ;;  %v277_v18 = vand.u32 127, %v276_v17  ;;  %v279_v19 = vshrl.u32 %v276_v17, 7  ;;  %vm383_vm5 = vcmask 1041408  }
  0x38   : > { %v940_v9 = vld [vmem:[%s216_s28 + $0x38] sm:$0xff]  ;;  %252 = vadd.xlane.f32.xlu0 %v251_v3  ;;  %v254_v10 = vadd.f32 %v934_v6, %v932_v5  ;;  %v269_v14 = vld [vmem:[%s1027_s1 + $0x10] sm:$0xff]  ;;  %v267_v16 = vld [vmem:[%s1027_s1] sm:$0xff]  ;;  %vm379_vm6 = vcmask 15360   ;;  %s242_s29 = scalar_lea.vmem [#allocation5], %s592_s25  ;;  %s603_s14 = sshll.u32 %s836_s22, 10 }
  0x39   : > { %258 = vadd.xlane.f32.xlu1 %v257_v7  ;;  %v260_v11 = vadd.f32 %v940_v9, %v938_v8  ;;  %v270_v13 = vld [vmem:[%s1027_s1 + $0x18] sm:$0xff]  ;;  %v282_v20 = vadd.s32 4294967288, %v277_v18  ;;  %v289_v22 = vadd.s32 4294967280, %v277_v18  ;;  %v296_v23 = vadd.s32 4294967272, %v277_v18  ;;  %v377_v42 = vld [vmem:[%s1029_s3] sm:$0x3]  ;;  %s981_s16 = scalar_lea.hbm %s1031_s5, %s603_s14 }
  0x3a   : > { %612 = vmatpush3.msra.mxu0 %v270_v13  ;;  %v280_v25 = vsub.s32 %v277_v18, %v279_v19  ;;  %623 = vmatpush3.msk.msra.mxu1 %vm383_vm5, %v377_v42  ;;  %v271_v43 = vld [vmem:[%s1028_s2] sm:$0x1]  ;;  %v465_v56 = vsub.s32 0, %v279_v19  ;;  %s512_s12 = sshll.u32 %s242_s29, 4  ;;  %s499_s22 = scalar_lea.sflag [#allocation4], %s912_s23  ;;  %s976_s12 = int_to_ptr.vmem [resolvable:$true] %s512_s12 }
  0x3b   : > { %613 = vmatprep.subr.mxu0 %v780_v12  ;;  %v285_v27 = vsub.s32 %v282_v20, %v279_v19  ;;  %v292_v28 = vsub.s32 %v289_v22, %v279_v19  ;;  %v299_v31 = vsub.s32 %v296_v23, %v279_v19  ;;  %v378_v48 = vld [vmem:[%s1030_s4] sm:$0x1]  ;;  %s711_s8 = scalar_lea.vmem %s976_s12, 1024  ;;  %p1040_p12 = scmp.ne.s32.totalorder %s1036_s30, 0 }
  0x3c   : > { %255 = vadd.xlane.f32.xlu0 %v254_v10  ;;  %614 = vmatpush3.msra.mxu0 %v269_v14  ;;  %p712_p11 = scmp.ne.s32.totalorder %s976_s12, %s711_s8  ;;  %s782_s7 = smov [#allocation5]  }
  0x3d   : > { %261 = vadd.xlane.f32.xlu1 %v260_v11  ;;  %615 = vmatprep.subr.mxu0 %v780_v12  ;;  %s715_s9 = sshll.u32 %s782_s7, 4  ;;  %s716_s9 = int_to_ptr.vmem [resolvable:$false] %s715_s9 }
  0x3e   : > { %616 = vmatpush3.msra.mxu0 %v268_v15  ;;  %p713_p13 = pnand %p712_p11, %p1040_p12  ;;  %s717_s10 = scalar_lea.vmem %s716_s9, 2048 }
  0x3f   : > { %617 = vmatprep.subr.mxu0 %v780_v12  ;;  %p718_p5 = scmp.lt.s32.totalorder %s976_s12, %s716_s9  ;;  %p719_p7 = scmp.lt.s32.totalorder %s717_s10, %s711_s8 }
  0x40   : > { %618 = vmatpush3.msra.mxu0 %v267_v16  ;;  %p714_p4 = pneg %p713_p13 }
  0x41   : > { %p720_p8 = por %p719_p7, %p718_p5 }
  0x43   : > { %p721_p10 = pnand %p720_p8, %p714_p4 }
  0xc1   : > { %v253_v21 = vpop.xlane.xlu0 %252 }
  0xc2   : > { %v259_v24 = vpop.xlane.xlu1 %258  ;;  %v263_v26 = vmul.f32 0.00390625, %v253_v21 }
  0xc3   : > { %v265_v29 = vmul.f32 0.00390625, %v259_v24 }
  0xc4   : > { %v281_v35 = vrot.slane %v263_v26, %v280_v25 }
  0xc5   : > { %v256_v30 = vpop.xlane.xlu0 %255  ;;  %v293_v37 = vrot.slane %v265_v29, %v292_v28 }
  0xc6   : > { %v264_v32 = vmul.f32 0.00390625, %v256_v30  ;;  %v262_v33 = vpop.xlane.xlu1 %261 }
  0xc7   : > { %v266_v34 = vmul.f32 0.00390625, %v262_v33 }
  0xc8   : > { %v286_v36 = vrot.slane %v264_v32, %v285_v27 }
  0xc9   : > { %v300_v38 = vrot.slane %v266_v34, %v299_v31 }
  0xca   : > { %v288_v39 = vsel %vm287_vm1, %v286_v36, %v281_v35 }
  0xcb   : > { %v295_v40 = vsel %vm294_vm2, %v293_v37, %v288_v39 }
  0xcc   : > { %v302_v41 = vsel %vm301_vm3, %v300_v38, %v295_v40 }
  0xcd   : > { %620 = vmatmul.mubr.msk.f32.vlgmr.msra.gmra.mxu0 %vm303_vm4, %v302_v41 }
 0x18d   : > { %v372_v44 = vpop.f32.mrf.mxu0 }
 0x18e   : > { %v373_v45 = vadd.f32 %v372_v44, %v271_v43 }
 0x18f   : > { %v621_v46 = vpop.f32.mrf.mxu0 }
 0x190   : > { %v376_v47 = vmax.f32 %v373_v45, 0.0 }
 0x192   : > { %625 = vmatmul.mubr.msk.f32.vlgmr.msra.gmra.mxu1 %vm379_vm6, %v376_v47 }
 0x252   : > { %v453_v49 = vpop.f32.mrf.mxu1 }
 0x253   : > { %v454_v50 = vadd.f32 %v453_v49, %v378_v48 }
 0x254   : > { %v626_v51 = vpop.f32.mrf.mxu1 }
 0x255   : > { %v457_v52 = vsub.f32 0.0, %v454_v50 }
 0x257   : > { %v458_v53 = vmul.f32 1.442695, %v457_v52 }
 0x259   : > { %679 = vpow2.f32 %v458_v53 }
 0x266   : > { %v680_v54 = vpop.eup %679 }
 0x267   : > { %v460_v55 = vadd.f32 1.0, %v680_v54 }
 0x269   : > { %681 = vrcp.f32 %v460_v55 }
 0x276   : > { %v682_v57 = vpop.eup %681 }
 0x277   : > { %v466_v58 = vrot.slane %v682_v57, %v465_v56 }
 0x279   : > { %472 = vbcast.lane.b32.xlu1 %v466_v58, 264  ;;  %468 = vbcast.lane.b32.xlu0 %v466_v58, 256 }
 0x27d   : > { %476 = vbcast.lane.b32.xlu1 %v466_v58, 272 }
 0x281   : > { %480 = vbcast.lane.b32.xlu1 %v466_v58, 280 }
 0x2eb   : > { %v473_v59 = vpop.permute.xlu1 %472  ;;  %v469_v60 = vpop.permute.xlu0 %468 }
 0x2ec   : > { %v484_v61 = vmul.f32 %v473_v59, %v932_v5  ;;  %v485_v62 = vmul.f32 %v473_v59, %v934_v6  ;;  %v482_v63 = vmul.f32 %v469_v60, %v922_v0  ;;  %v483_v3 = vmul.f32 %v469_v60, %v924_v1 }
 0x2ee   : > { %492 = vst [vmem:[%s242_s29 + $0x10] sm:$0xff] %v484_v61  ;;  %493 = vst [vmem:[%s242_s29 + $0x18] sm:$0xff] %v485_v62 }
 0x2ef   : > { %490 = vst [vmem:[%s242_s29] sm:$0xff] %v482_v63  ;;  %491 = vst [vmem:[%s242_s29 + $0x8] sm:$0xff] %v483_v3  ;;  %v477_v7 = vpop.permute.xlu1 %476 }
 0x2f0   : > { %v486_v10 = vmul.f32 %v477_v7, %v926_v2  ;;  %v487_v5 = vmul.f32 %v477_v7, %v930_v4 }
 0x2f2   : > { %494 = vst [vmem:[%s242_s29 + $0x20] sm:$0xff] %v486_v10  ;;  %495 = vst [vmem:[%s242_s29 + $0x28] sm:$0xff] %v487_v5 }
 0x2f3   : > { %v481_v0 = vpop.permute.xlu1 %480 }
 0x2f4   : > { %v488_v1 = vmul.f32 %v481_v0, %v938_v8  ;;  %v489_v2 = vmul.f32 %v481_v0, %v940_v9 }
 0x2f6   : > { %496 = vst [vmem:[%s242_s29 + $0x30] sm:$0xff] %v488_v1  ;;  %497 = vst [vmem:[%s242_s29 + $0x38] sm:$0xff] %v489_v2 }
 0x2f7   : > { %724 = shalt.err (!%p721_p10)
}
 0x2f8   : > { %s725_s11 = scalar_lea.hbm %s981_s16, 1024  ;;  %s729_s26 = scalar_lea.hbm %s1031_s5, 2048 }
 0x2f9   : > { %p726_p0 = scmp.ne.s32.totalorder %s981_s16, %s725_s11  ;;  %p730_p1 = scmp.lt.s32.totalorder %s981_s16, %s1031_s5 }
 0x2fa   : > { %p731_p3 = scmp.lt.s32.totalorder %s729_s26, %s725_s11 }
 0x2fb   : > { %p727_p2 = pnand %p726_p0, %p1040_p12 }
 0x2fc   : > { %p732_p6 = por %p731_p3, %p730_p1 }
 0x2fd   : > { %p728_p9 = pneg %p727_p2 }
 0x2ff   : > { %p733_p11 = pnand %p732_p6, %p728_p9 }
 0x301   : > { %736 = shalt.err (!%p733_p11)
}
 0x302   : > { %s783_s14 = smov 256   ;;  %s784_s25 = smov 16  }
 0x303   : > { %629 = dma.vmem_to_hbm [thread:$0]  (%p1040_p12), %s976_s12, 1024, %s981_s16, %s499_s22, %s783_s14, %s783_s14, %s784_s25  }
 0x304 PF: > { %s527_s15 = sand.u32 1, %s763_s18   ;;  %p1041_p13 = scmp.ne.s32.totalorder %s1037_s6, 0 }
 0x305   : > { %p1042_p4 = scmp.ge.s32.totalorder %s775_s21, 2  ;;  %s528_s8 = scalar_lea.sflag [#allocation4], %s527_s15 }
 0x307   : > { %p636_p5 = pnand %p1042_p4, %p1041_p13 }
 0x309   : > { %p637_p7 = pneg %p636_p5 }
 0x30b   : > { %758 = dma.done.wait (%p637_p7), %s528_s8, 1024  }
 0x30c   : > { %760 = vsyncadd (%p637_p7), %s528_s8, 4294966272  ;;  %p18_p8 = scmp.ge.s32.totalorder %s840_s24, 4   ;;  %s1043_s18 = smov %s767_s19 }
 0x30d   : > { %s1044_s19 = smov %s771_s20  ;;  %s1045_s20 = smov %s852_s27 }
 0x30e   : > { %s1046_s21 = smov %s840_s24  ;;  %20 = sbr.rel (!%p18_p8) target bundleno = 5 (0x5), region = 85 }
 0x313   :  { %533 = vsyncpa [#allocation3], 1 }
 0x314   :  { %535 = vsyncpa [#allocation3 + $0x1], 1 }
 0x315   :  { %536 = vsyncpa [#allocation4], 1 }
 0x316   :  { %538 = vsyncpa [#allocation4 + $0x1], 1 }

</bundles_post_ra>
